<compile_context>
chip_gen: v6e
topology: v6e:2x2x1
jax: 0.10.0
libtpu: 0.0.40
codegen_flags: <defaults>
</compile_context>

<pallas_src>
import jax
import jax.numpy as jnp
from jax.experimental import pallas as pl
from jax.experimental.pallas import tpu as pltpu


def _copy_kernel(x_ref, o_ref):
    # Fusion site: whole-tile, lane-dense copy (one unmasked vld/vst stream
    # per tile).  Any fused elementwise work would be applied here.
    o_ref[...] = x_ref[...]


def _sublane_unit(dtype):
    """Dtype-aware sublane packing unit: 8 (f32), 16 (bf16/f16), 32 (int8/fp8)."""
    itemsize = jnp.dtype(dtype).itemsize
    return max(8, 32 // max(itemsize, 1))


def flatten(x):
    """torch Flatten semantics: (N, ...) -> (N, prod(rest)).

    Metadata-only on contiguous data — this is the recommended path for a
    bare flatten (no kernel launch, no HBM round-trip)."""
    N = x.shape[0]
    F = 1
    for d in x.shape[1:]:
        F *= d
    return x.reshape(N, F)


def flatten_pallas(x, *, lane_cap=2048, tile_bytes_cap=2 * 1024 * 1024):
    """Pallas-backed flatten.  Same semantics as flatten(); the copy kernel is
    kept only as the place where fused elementwise work would live."""
    N = x.shape[0]
    F = 1
    for d in x.shape[1:]:
        F *= d
    out2 = (N, F)

    total = N * F
    itemsize = jnp.dtype(x.dtype).itemsize
    unit = _sublane_unit(x.dtype)
    base = unit * 128  # minimum (sublane, lane)-dense slab

    # Empty or ragged total: flatten is metadata-only anyway — skip the kernel
    # rather than emit masked / full-extent (VMEM-OOM-prone) blocks.
    if total == 0 or total % base != 0:
        return x.reshape(out2)

    # Pick a lane width LANE (multiple of 128, <= lane_cap) such that
    # rows = total // LANE is a multiple of the sublane unit.  LANE = 128
    # always works because total % (unit * 128) == 0.
    LANE = 128
    cand = (lane_cap // 128) * 128
    while cand > 128:
        if total % cand == 0 and (total // cand) % unit == 0:
            LANE = cand
            break
        cand -= 128
    rows = total // LANE

    # Row tile: largest multiple of `unit` that divides `rows`, capped so a
    # single tile stays <= tile_bytes_cap (double-buffered in+out tiles then
    # fit comfortably under every generation's scoped-VMEM budget).
    max_tr = max(unit, (tile_bytes_cap // (LANE * itemsize)) // unit * unit)
    tr = min(rows, max_tr)
    tr = (tr // unit) * unit
    while rows % tr != 0:
        tr -= unit
    grid = (rows // tr,)

    slab = x.reshape(rows, LANE)  # structural; realizes the flatten
    out = pl.pallas_call(
        _copy_kernel,
        out_shape=jax.ShapeDtypeStruct((rows, LANE), x.dtype),
        grid=grid,
        in_specs=[pl.BlockSpec((tr, LANE), lambda i: (i, 0))],
        out_specs=pl.BlockSpec((tr, LANE), lambda i: (i, 0)),
        compiler_params=pltpu.CompilerParams(
            dimension_semantics=("parallel",),
            vmem_limit_bytes=32 * 1024 * 1024,
        ),
        # Pure memory op: let XLA overlap surrounding compute/collectives.
        cost_estimate=pl.CostEstimate(
            flops=0,
            transcendentals=0,
            bytes_accessed=2 * total * itemsize,
        ),
    )(slab)
    return out.reshape(out2)


if __name__ == "__main__":
    key = jax.random.PRNGKey(0)
    # Small shape consistent with a conv feature map: batch=2, channels=4, 16x16.
    x = jax.random.normal(key, (2, 4, 16, 16), dtype=jnp.float32)

    # Reference: plain reshape (same semantics as torch x.view(N, -1)).
    ref = x.reshape(x.shape[0], -1)

    # Fast (recommended) path: metadata-only flatten.
    y_fast = flatten(x)
    assert y_fast.shape == ref.shape and y_fast.dtype == ref.dtype
    assert jnp.array_equal(y_fast, ref), "reshape flatten mismatch"

    # Pallas fusion-site path: run the kernel once and verify.
    y = flatten_pallas(x)
    y = jax.block_until_ready(y)
    assert y.shape == ref.shape, (y.shape, ref.shape)
    assert y.dtype == ref.dtype, (y.dtype, ref.dtype)
    assert jnp.array_equal(y, ref), "Pallas flatten mismatch vs reference"

    print("KERNEL_OK")
</pallas_src>

<mosaic_0001>
module attributes {stable_mosaic.version = 11 : i64} {
  func.func @_copy_kernel(%arg0: i32, %arg1: memref<8x256xf32, #tpu.memory_space<vmem>>, %arg2: memref<8x256xf32, #tpu.memory_space<vmem>>) attributes {dimension_semantics = [#tpu.dimension_semantics<parallel>], iteration_bounds = array<i64: 1>, scalar_prefetch = 0 : i64, scratch_operands = 0 : i64, tpu.core_type = #tpu.core_type<tc>, window_params = [{transform_indices = @transform_0, window_bounds = array<i64: 8, 256>}, {transform_indices = @transform_1, window_bounds = array<i64: 8, 256>}]} {
    %c0 = arith.constant 0 : index
    %c0_0 = arith.constant 0 : index
    %0 = vector.load %arg1[%c0, %c0_0] : memref<8x256xf32, #tpu.memory_space<vmem>>, vector<8x256xf32>
    %c0_1 = arith.constant 0 : index
    %c0_2 = arith.constant 0 : index
    %1 = vector.load %arg2[%c0_1, %c0_2] : memref<8x256xf32, #tpu.memory_space<vmem>>, vector<8x256xf32>
    tpu.vector_store %arg2[%c0_1, %c0_2], %0 {strides = array<i32>} : memref<8x256xf32, #tpu.memory_space<vmem>>, vector<8x256xf32>,
    return
  }
  func.func @transform_0(%arg0: i32) -> (i32, i32) {
    %c0_i32 = arith.constant 0 : i32
    %c0_i32_0 = arith.constant 0 : i32
    return %arg0, %c0_i32 : i32, i32
  }
  func.func @transform_1(%arg0: i32) -> (i32, i32) {
    %c0_i32 = arith.constant 0 : i32
    %c0_i32_0 = arith.constant 0 : i32
    return %arg0, %c0_i32 : i32, i32
  }
}

</mosaic_0001>

<bundles_post_ra>
// kernel: tpu_custom_call.1
= control target key start
LH: loop header
LB: loop body
LE: loop exit
PB: predicated region body
PF: predicated region fallthrough
CT: control target
= control target key end

     0   :  { %6 = vsyncpa [#allocation3], 0  ;;  %s104_s0 = inlined_call_operand.hbm [shape: f32[8,256], index: 0, kind: input, shape index: {}]   ;;  %s105_s1 = inlined_call_operand.hbm [shape: f32[8,256], index: 1, kind: output, shape index: {}]  }
   0x1   :  { %7 = vsyncpa [#allocation4], 0  ;;  %s86_s6 = smov [#allocation2]  }
   0x2   :  { %s14_s7 = sshll.u32 %s86_s6, 4  ;;  %s15_s7 = int_to_ptr.vmem [resolvable:$true] %s14_s7 }
   0x3   :  { %s50_s8 = scalar_lea.vmem %s15_s7, 256  ;;  %p55_p1 = scmp.lt.s32.totalorder %s15_s7, %s15_s7 }
   0x4   :  { %p51_p0 = scmp.ne.s32.totalorder %s15_s7, %s50_s8  ;;  %p56_p2 = scmp.lt.s32.totalorder %s50_s8, %s50_s8 }
   0x6   :  { %p57_p3 = por %p56_p2, %p55_p1 }
   0x8   :  { %p58_p4 = pnand %p57_p3, %p51_p0 }
   0xa   :  { %61 = shalt.err (!%p58_p4)
}
   0xb   :  { %17 = dma.hbm_to_vmem [thread:$0]  %s104_s0, 256, %s15_s7, [#allocation3]  }
   0xc   :  { %82 = dma.done.wait [#allocation3], 256  }
   0xd   :  { %83 = vsyncadd [#allocation3], 4294967040  ;;  %s87_s11 = smov [#allocation5]   ;;  %v21_v0 = vld [vmem:[#allocation2] sm:$0xff]  ;;  %v22_v1 = vld [vmem:[#allocation2 + $0x8] sm:$0xff] }
   0xe   :  { %s31_s12 = sshll.u32 %s87_s11, 4  ;;  %23 = vst [vmem:[#allocation5] sm:$0xff] %v21_v0  ;;  %24 = vst [vmem:[#allocation5 + $0x8] sm:$0xff] %v22_v1  ;;  %s32_s12 = int_to_ptr.vmem [resolvable:$true] %s31_s12 }
   0xf   :  { %s62_s13 = scalar_lea.vmem %s32_s12, 256  ;;  %p67_p6 = scmp.lt.s32.totalorder %s32_s12, %s32_s12 }
  0x10   :  { %p63_p5 = scmp.ne.s32.totalorder %s32_s12, %s62_s13  ;;  %p68_p7 = scmp.lt.s32.totalorder %s62_s13, %s62_s13 }
  0x12   :  { %p69_p8 = por %p68_p7, %p67_p6 }
  0x14   :  { %p70_p9 = pnand %p69_p8, %p63_p5 }
  0x16   :  { %73 = shalt.err (!%p70_p9)
}
  0x17   :  { %34 = dma.vmem_to_hbm [thread:$0]  %s32_s12, 256, %s105_s1, [#allocation4]  }
  0x18   :  { %84 = dma.done.wait [#allocation4], 256  }
  0x19   :  { %85 = vsyncadd [#allocation4], 4294967040 }
  0x1a   :  { %38 = vsyncpa [#allocation3], 1 }
  0x1b   :  { %39 = vsyncpa [#allocation4], 1 }

</bundles_post_ra>
